<compile_context>
chip_gen: v6e
topology: v6e:2x2x1
jax: 0.10.0
libtpu: 0.0.40
codegen_flags: <defaults>
</compile_context>

<pallas_src>
import jax
import jax.numpy as jnp
from jax.experimental import pallas as pl
from jax.experimental.pallas import tpu as pltpu

# The PyTorch forward divides by the module-level global hidden_dim (= 512); it is
# only used inside the softmax that is provably the identity here, so it cancels.
_GLOBAL_HIDDEN_DIM = 512.0


def _round_up(x, m):
    return (x + m - 1) // m * m


def _cross_modal_kernel(img_ref, txt_ref, wr_ref, br_ref, ww_ref, bw_ref,
                        inter_ref, imgp_ref):
    # bf16 operands on the MXU, f32 accumulation; f32 bias add.
    image_proj = jnp.dot(img_ref[...], wr_ref[...],
                         preferred_element_type=jnp.float32) + br_ref[...]   # (TB, H) f32
    text_proj = jnp.dot(txt_ref[...], ww_ref[...],
                        preferred_element_type=jnp.float32) + bw_ref[...]    # (TB, H) f32

    # Softmax over the size-1 text-sequence axis is identically 1.0, so
    # interactive_text_features == text_proj exactly (the 1/sqrt(512) scale
    # cancels inside the identity softmax).  Dead work removed.
    imgp_ref[...] = image_proj.astype(imgp_ref.dtype)
    inter_ref[...] = text_proj.astype(inter_ref.dtype)


def cross_modal_alignment(image_features, text_features, w_region, b_region,
                          w_word, b_word, *, block_b=512):
    # Softmax elision is only valid for a length-1 text sequence, i.e. 2-D inputs
    # that the module unsqueezes to (B, 1, D).
    assert image_features.ndim == 2 and text_features.ndim == 2, (
        "cross_modal_alignment expects 2-D (B, dim) inputs (seq len 1 after unsqueeze)")

    B, Dr = image_features.shape
    Dw = text_features.shape[1]
    H = w_region.shape[1]

    # bf16 streaming operands (halved HBM traffic, native MXU path); f32 biases.
    img_bf = image_features.astype(jnp.bfloat16)
    txt_bf = text_features.astype(jnp.bfloat16)
    wr_bf = w_region.astype(jnp.bfloat16)
    ww_bf = w_word.astype(jnp.bfloat16)
    br = b_region.reshape(1, H).astype(jnp.float32)
    bw = b_word.reshape(1, H).astype(jnp.float32)

    # Batch tile: multiple of 8 (sublane), at least 4 grid steps where possible
    # (v7x megacore: >= 2 steps per TC so DMA/compute overlap), capped at block_b
    # so double-buffered tiles stay inside v7x's 64 MiB VMEM.  No padding: the
    # ragged last block is clipped by Pallas, so no wrapper pad/slice round trip.
    tb = min(block_b, _round_up(max(1, pl.cdiv(B, 4)), 8))
    if tb >= B:
        tb = B          # single block; block dim == full array dim is always legal
    grid = (pl.cdiv(B, tb),)

    cost = pl.CostEstimate(
        flops=2 * B * (Dr + Dw) * H,
        transcendentals=0,
        bytes_accessed=(2 * B * (Dr + Dw)      # bf16 activation reads
                        + 2 * (Dr + Dw) * H    # bf16 weight reads
                        + 4 * 2 * H            # f32 bias reads
                        + 4 * 2 * B * H),      # f32 output writes (dominant)
    )

    def _call(weight_pipeline_mode):
        def resident(shape):
            index_map = lambda i: (0,) * len(shape)
            if weight_pipeline_mode is None:
                return pl.BlockSpec(shape, index_map)
            return pl.BlockSpec(shape, index_map,
                                pipeline_mode=weight_pipeline_mode)

        return pl.pallas_call(
            _cross_modal_kernel,
            out_shape=(
                jax.ShapeDtypeStruct((B, H), jnp.float32),
                jax.ShapeDtypeStruct((B, H), jnp.float32),
            ),
            grid=grid,
            in_specs=[
                pl.BlockSpec((tb, Dr), lambda i: (i, 0)),   # image features (streamed)
                pl.BlockSpec((tb, Dw), lambda i: (i, 0)),   # text features  (streamed)
                resident((Dr, H)),                          # region weight  (VMEM-resident)
                resident((1, H)),                           # region bias    (VMEM-resident)
                resident((Dw, H)),                          # word weight    (VMEM-resident)
                resident((1, H)),                           # word bias      (VMEM-resident)
            ],
            out_specs=(
                pl.BlockSpec((tb, H), lambda i: (i, 0)),
                pl.BlockSpec((tb, H), lambda i: (i, 0)),
            ),
            compiler_params=pltpu.CompilerParams(
                dimension_semantics=("parallel",),
                vmem_limit_bytes=48 * 1024 * 1024),
            cost_estimate=cost,
        )(img_bf, txt_bf, wr_bf, br, ww_bf, bw)

    try:
        # Single-buffer the grid-invariant weights/biases (halves their VMEM
        # footprint, matters on v7x's 64 MiB VMEM for large region/word dims).
        inter2d, imgp2d = _call(pl.Buffered(1))
    except Exception:
        # Fallback for JAX versions without BlockSpec pipeline_mode support.
        inter2d, imgp2d = _call(None)

    # Restore the PyTorch (B, 1, H) sequence dim; degenerate-dim reshape only
    # (no slice, no data movement).
    return inter2d[:, None, :], imgp2d[:, None, :]


def _reference(image_features, text_features, w_region, b_region, w_word, b_word):
    img = image_features[:, None, :]                      # (B, 1, Dr)
    txt = text_features[:, None, :]                       # (B, 1, Dw)
    image_proj = img @ w_region + b_region                # (B, 1, H)
    text_proj = txt @ w_word + b_word                     # (B, 1, H)
    aff = image_proj @ jnp.swapaxes(text_proj, 1, 2)      # (B, 1, 1)
    aff = jax.nn.softmax(aff / _GLOBAL_HIDDEN_DIM ** 0.5, axis=-1)
    inter = aff @ text_proj                               # (B, 1, H)
    return inter, image_proj


if __name__ == "__main__":
    B, region_dim, word_dim, hidden = 2, 16, 24, 32

    key = jax.random.PRNGKey(0)
    k_img, k_txt, k_wr, k_br, k_ww, k_bw = jax.random.split(key, 6)

    image_features = jax.random.normal(k_img, (B, region_dim), dtype=jnp.float32)
    text_features = jax.random.normal(k_txt, (B, word_dim), dtype=jnp.float32)

    # Deterministic "nn.Linear"-style params (stored transposed: (in, out)).
    w_region = jax.random.normal(k_wr, (region_dim, hidden), dtype=jnp.float32) * 0.05
    b_region = jax.random.normal(k_br, (hidden,), dtype=jnp.float32) * 0.05
    w_word = jax.random.normal(k_ww, (word_dim, hidden), dtype=jnp.float32) * 0.05
    b_word = jax.random.normal(k_bw, (hidden,), dtype=jnp.float32) * 0.05

    inter, image_proj = cross_modal_alignment(
        image_features, text_features, w_region, b_region, w_word, b_word)
    jax.block_until_ready((inter, image_proj))

    ref_inter, ref_imgp = _reference(
        image_features, text_features, w_region, b_region, w_word, b_word)

    assert inter.shape == (B, 1, hidden) and image_proj.shape == (B, 1, hidden)
    # bf16 streaming operands (f32 accumulation) vs. the f32 reference.
    assert jnp.allclose(inter, ref_inter, atol=2e-2, rtol=2e-2)
    assert jnp.allclose(image_proj, ref_imgp, atol=2e-2, rtol=2e-2)

    print("KERNEL_OK")
</pallas_src>

<mosaic_0001>
module attributes {stable_mosaic.version = 11 : i64} {
  func.func @_cross_modal_kernel(%arg0: i32, %arg1: memref<2x16xbf16, #tpu.memory_space<vmem>>, %arg2: memref<2x24xbf16, #tpu.memory_space<vmem>>, %arg3: memref<16x32xbf16, #tpu.memory_space<vmem>>, %arg4: memref<1x32xf32, #tpu.memory_space<vmem>>, %arg5: memref<24x32xbf16, #tpu.memory_space<vmem>>, %arg6: memref<1x32xf32, #tpu.memory_space<vmem>>, %arg7: memref<2x32xf32, #tpu.memory_space<vmem>>, %arg8: memref<2x32xf32, #tpu.memory_space<vmem>>) attributes {dimension_semantics = [#tpu.dimension_semantics<parallel>], iteration_bounds = array<i64: 1>, scalar_prefetch = 0 : i64, scratch_operands = 0 : i64, tpu.core_type = #tpu.core_type<tc>, window_params = [{transform_indices = @transform_0, window_bounds = array<i64: 2, 16>}, {transform_indices = @transform_1, window_bounds = array<i64: 2, 24>}, {pipeline_mode = #tpu.pipeline_mode<synchronous>, transform_indices = @transform_2, window_bounds = array<i64: 16, 32>}, {pipeline_mode = #tpu.pipeline_mode<synchronous>, transform_indices = @transform_3, window_bounds = array<i64: 1, 32>}, {pipeline_mode = #tpu.pipeline_mode<synchronous>, transform_indices = @transform_4, window_bounds = array<i64: 24, 32>}, {pipeline_mode = #tpu.pipeline_mode<synchronous>, transform_indices = @transform_5, window_bounds = array<i64: 1, 32>}, {transform_indices = @transform_6, window_bounds = array<i64: 2, 32>}, {transform_indices = @transform_7, window_bounds = array<i64: 2, 32>}]} {
    %c0 = arith.constant 0 : index
    %c0_0 = arith.constant 0 : index
    %0 = vector.load %arg1[%c0, %c0_0] : memref<2x16xbf16, #tpu.memory_space<vmem>>, vector<2x16xbf16>
    %c0_1 = arith.constant 0 : index
    %c0_2 = arith.constant 0 : index
    %1 = vector.load %arg3[%c0_1, %c0_2] : memref<16x32xbf16, #tpu.memory_space<vmem>>, vector<16x32xbf16>
    %cst = arith.constant dense<0.000000e+00> : vector<2x32xf32>
    %2 = tpu.matmul %0, %1, %cst {dimension_numbers = #tpu.dot_dimension_numbers<[1], [0], [0], [1], [0, 0, 1, 1], [], []>} : vector<2x16xbf16>, vector<16x32xbf16>, vector<2x32xf32> -> vector<2x32xf32>
    %c0_3 = arith.constant 0 : index
    %c0_4 = arith.constant 0 : index
    %3 = vector.load %arg4[%c0_3, %c0_4] : memref<1x32xf32, #tpu.memory_space<vmem>>, vector<1x32xf32>
    %4 = vector.broadcast %3 : vector<1x32xf32> to vector<2x32xf32>
    %5 = arith.addf %2, %4 : vector<2x32xf32>
    %c0_5 = arith.constant 0 : index
    %c0_6 = arith.constant 0 : index
    %6 = vector.load %arg2[%c0_5, %c0_6] : memref<2x24xbf16, #tpu.memory_space<vmem>>, vector<2x24xbf16>
    %c0_7 = arith.constant 0 : index
    %c0_8 = arith.constant 0 : index
    %7 = vector.load %arg5[%c0_7, %c0_8] : memref<24x32xbf16, #tpu.memory_space<vmem>>, vector<24x32xbf16>
    %cst_9 = arith.constant dense<0.000000e+00> : vector<2x32xf32>
    %8 = tpu.matmul %6, %7, %cst_9 {dimension_numbers = #tpu.dot_dimension_numbers<[1], [0], [0], [1], [0, 0, 1, 1], [], []>} : vector<2x24xbf16>, vector<24x32xbf16>, vector<2x32xf32> -> vector<2x32xf32>
    %c0_10 = arith.constant 0 : index
    %c0_11 = arith.constant 0 : index
    %9 = vector.load %arg6[%c0_10, %c0_11] : memref<1x32xf32, #tpu.memory_space<vmem>>, vector<1x32xf32>
    %10 = vector.broadcast %9 : vector<1x32xf32> to vector<2x32xf32>
    %11 = arith.addf %8, %10 : vector<2x32xf32>
    %c0_12 = arith.constant 0 : index
    %c0_13 = arith.constant 0 : index
    %12 = vector.load %arg8[%c0_12, %c0_13] : memref<2x32xf32, #tpu.memory_space<vmem>>, vector<2x32xf32>
    tpu.vector_store %arg8[%c0_12, %c0_13], %5 {strides = array<i32>} : memref<2x32xf32, #tpu.memory_space<vmem>>, vector<2x32xf32>,
    %c0_14 = arith.constant 0 : index
    %c0_15 = arith.constant 0 : index
    %13 = vector.load %arg7[%c0_14, %c0_15] : memref<2x32xf32, #tpu.memory_space<vmem>>, vector<2x32xf32>
    tpu.vector_store %arg7[%c0_14, %c0_15], %11 {strides = array<i32>} : memref<2x32xf32, #tpu.memory_space<vmem>>, vector<2x32xf32>,
    return
  }
  func.func @transform_0(%arg0: i32) -> (i32, i32) {
    %c0_i32 = arith.constant 0 : i32
    %c0_i32_0 = arith.constant 0 : i32
    return %arg0, %c0_i32 : i32, i32
  }
  func.func @transform_1(%arg0: i32) -> (i32, i32) {
    %c0_i32 = arith.constant 0 : i32
    %c0_i32_0 = arith.constant 0 : i32
    return %arg0, %c0_i32 : i32, i32
  }
  func.func @transform_2(%arg0: i32) -> (i32, i32) {
    %c0_i32 = arith.constant 0 : i32
    %c0_i32_0 = arith.constant 0 : i32
    %c0_i32_1 = arith.constant 0 : i32
    return %c0_i32, %c0_i32_0 : i32, i32
  }
  func.func @transform_3(%arg0: i32) -> (i32, i32) {
    %c0_i32 = arith.constant 0 : i32
    %c0_i32_0 = arith.constant 0 : i32
    %c0_i32_1 = arith.constant 0 : i32
    return %c0_i32, %c0_i32_0 : i32, i32
  }
  func.func @transform_4(%arg0: i32) -> (i32, i32) {
    %c0_i32 = arith.constant 0 : i32
    %c0_i32_0 = arith.constant 0 : i32
    %c0_i32_1 = arith.constant 0 : i32
    return %c0_i32, %c0_i32_0 : i32, i32
  }
  func.func @transform_5(%arg0: i32) -> (i32, i32) {
    %c0_i32 = arith.constant 0 : i32
    %c0_i32_0 = arith.constant 0 : i32
    %c0_i32_1 = arith.constant 0 : i32
    return %c0_i32, %c0_i32_0 : i32, i32
  }
  func.func @transform_6(%arg0: i32) -> (i32, i32) {
    %c0_i32 = arith.constant 0 : i32
    %c0_i32_0 = arith.constant 0 : i32
    return %arg0, %c0_i32 : i32, i32
  }
  func.func @transform_7(%arg0: i32) -> (i32, i32) {
    %c0_i32 = arith.constant 0 : i32
    %c0_i32_0 = arith.constant 0 : i32
    return %arg0, %c0_i32 : i32, i32
  }
}

module attributes {stable_mosaic.version = 11 : i64} {
  func.func @_cross_modal_kernel(%arg0: i32, %arg1: memref<2x16xbf16, #tpu.memory_space<vmem>>, %arg2: memref<2x24xbf16, #tpu.memory_space<vmem>>, %arg3: memref<16x32xbf16, #tpu.memory_space<vmem>>, %arg4: memref<1x32xf32, #tpu.memory_space<vmem>>, %arg5: memref<24x32xbf16, #tpu.memory_space<vmem>>, %arg6: memref<1x32xf32, #tpu.memory_space<vmem>>, %arg7: memref<2x32xf32, #tpu.memory_space<vmem>>, %arg8: memref<2x32xf32, #tpu.memory_space<vmem>>) attributes {dimension_semantics = [#tpu.dimension_semantics<parallel>], iteration_bounds = array<i64: 1>, scalar_prefetch = 0 : i64, scratch_operands = 0 : i64, tpu.core_type = #tpu.core_type<tc>, window_params = [{transform_indices = @transform_0, window_bounds = array<i64: 2, 16>}, {transform_indices = @transform_1, window_bounds = array<i64: 2, 24>}, {pipeline_mode = #tpu.pipeline_mode<synchronous>, transform_indices = @transform_2, window_bounds = array<i64: 16, 32>}, {pipeline_mode = #tpu.pipeline_mode<synchronous>, transform_indices = @transform_3, window_bounds = array<i64: 1, 32>}, {pipeline_mode = #tpu.pipeline_mode<synchronous>, transform_indices = @transform_4, window_bounds = array<i64: 24, 32>}, {pipeline_mode = #tpu.pipeline_mode<synchronous>, transform_indices = @transform_5, window_bounds = array<i64: 1, 32>}, {transform_indices = @transform_6, window_bounds = array<i64: 2, 32>}, {transform_indices = @transform_7, window_bounds = array<i64: 2, 32>}]} {
    %c0 = arith.constant 0 : index
    %c0_0 = arith.constant 0 : index
    %0 = vector.load %arg1[%c0, %c0_0] : memref<2x16xbf16, #tpu.memory_space<vmem>>, vector<2x16xbf16>
    %c0_1 = arith.constant 0 : index
    %c0_2 = arith.constant 0 : index
    %1 = vector.load %arg3[%c0_1, %c0_2] : memref<16x32xbf16, #tpu.memory_space<vmem>>, vector<16x32xbf16>
    %cst = arith.constant dense<0.000000e+00> : vector<2x32xf32>
    %2 = tpu.matmul %0, %1, %cst {dimension_numbers = #tpu.dot_dimension_numbers<[1], [0], [0], [1], [0, 0, 1, 1], [], []>} : vector<2x16xbf16>, vector<16x32xbf16>, vector<2x32xf32> -> vector<2x32xf32>
    %c0_3 = arith.constant 0 : index
    %c0_4 = arith.constant 0 : index
    %3 = vector.load %arg4[%c0_3, %c0_4] : memref<1x32xf32, #tpu.memory_space<vmem>>, vector<1x32xf32>
    %4 = vector.broadcast %3 : vector<1x32xf32> to vector<2x32xf32>
    %5 = arith.addf %2, %4 : vector<2x32xf32>
    %c0_5 = arith.constant 0 : index
    %c0_6 = arith.constant 0 : index
    %6 = vector.load %arg2[%c0_5, %c0_6] : memref<2x24xbf16, #tpu.memory_space<vmem>>, vector<2x24xbf16>
    %c0_7 = arith.constant 0 : index
    %c0_8 = arith.constant 0 : index
    %7 = vector.load %arg5[%c0_7, %c0_8] : memref<24x32xbf16, #tpu.memory_space<vmem>>, vector<24x32xbf16>
    %cst_9 = arith.constant dense<0.000000e+00> : vector<2x32xf32>
    %8 = tpu.matmul %6, %7, %cst_9 {dimension_numbers = #tpu.dot_dimension_numbers<[1], [0], [0], [1], [0, 0, 1, 1], [], []>} : vector<2x24xbf16>, vector<24x32xbf16>, vector<2x32xf32> -> vector<2x32xf32>
    %c0_10 = arith.constant 0 : index
    %c0_11 = arith.constant 0 : index
    %9 = vector.load %arg6[%c0_10, %c0_11] : memref<1x32xf32, #tpu.memory_space<vmem>>, vector<1x32xf32>
    %10 = vector.broadcast %9 : vector<1x32xf32> to vector<2x32xf32>
    %11 = arith.addf %8, %10 : vector<2x32xf32>
    %c0_12 = arith.constant 0 : index
    %c0_13 = arith.constant 0 : index
    %12 = vector.load %arg8[%c0_12, %c0_13] : memref<2x32xf32, #tpu.memory_space<vmem>>, vector<2x32xf32>
    tpu.vector_store %arg8[%c0_12, %c0_13], %5 {strides = array<i32>} : memref<2x32xf32, #tpu.memory_space<vmem>>, vector<2x32xf32>,
    %c0_14 = arith.constant 0 : index
    %c0_15 = arith.constant 0 : index
    %13 = vector.load %arg7[%c0_14, %c0_15] : memref<2x32xf32, #tpu.memory_space<vmem>>, vector<2x32xf32>
    tpu.vector_store %arg7[%c0_14, %c0_15], %11 {strides = array<i32>} : memref<2x32xf32, #tpu.memory_space<vmem>>, vector<2x32xf32>,
    return
  }
  func.func @transform_0(%arg0: i32) -> (i32, i32) {
    %c0_i32 = arith.constant 0 : i32
    %c0_i32_0 = arith.constant 0 : i32
    return %arg0, %c0_i32 : i32, i32
  }
  func.func @transform_1(%arg0: i32) -> (i32, i32) {
    %c0_i32 = arith.constant 0 : i32
    %c0_i32_0 = arith.constant 0 : i32
    return %arg0, %c0_i32 : i32, i32
  }
  func.func @transform_2(%arg0: i32) -> (i32, i32) {
    %c0_i32 = arith.constant 0 : i32
    %c0_i32_0 = arith.constant 0 : i32
    %c0_i32_1 = arith.constant 0 : i32
    return %c0_i32, %c0_i32_0 : i32, i32
  }
  func.func @transform_3(%arg0: i32) -> (i32, i32) {
    %c0_i32 = arith.constant 0 : i32
    %c0_i32_0 = arith.constant 0 : i32
    %c0_i32_1 = arith.constant 0 : i32
    return %c0_i32, %c0_i32_0 : i32, i32
  }
  func.func @transform_4(%arg0: i32) -> (i32, i32) {
    %c0_i32 = arith.constant 0 : i32
    %c0_i32_0 = arith.constant 0 : i32
    %c0_i32_1 = arith.constant 0 : i32
    return %c0_i32, %c0_i32_0 : i32, i32
  }
  func.func @transform_5(%arg0: i32) -> (i32, i32) {
    %c0_i32 = arith.constant 0 : i32
    %c0_i32_0 = arith.constant 0 : i32
    %c0_i32_1 = arith.constant 0 : i32
    return %c0_i32, %c0_i32_0 : i32, i32
  }
  func.func @transform_6(%arg0: i32) -> (i32, i32) {
    %c0_i32 = arith.constant 0 : i32
    %c0_i32_0 = arith.constant 0 : i32
    return %arg0, %c0_i32 : i32, i32
  }
  func.func @transform_7(%arg0: i32) -> (i32, i32) {
    %c0_i32 = arith.constant 0 : i32
    %c0_i32_0 = arith.constant 0 : i32
    return %arg0, %c0_i32 : i32, i32
  }
}

</mosaic_0001>

<bundles_post_ra>
// kernel: tpu_custom_call.1
= control target key start
LH: loop header
LB: loop body
LE: loop exit
PB: predicated region body
PF: predicated region fallthrough
CT: control target
= control target key end

     0   :  { %13 = vsyncpa [#allocation3], 0  ;;  %s449_s0 = inlined_call_operand.hbm [shape: bf16[2,16], index: 0, kind: input, shape index: {}]   ;;  %s450_s1 = inlined_call_operand.vmem [shape: bf16[2,24], index: 1, kind: input, shape index: {}]   ;;  %s451_s2 = inlined_call_operand.hbm [shape: bf16[16,32], index: 2, kind: input, shape index: {}]   ;;  %s452_s3 = inlined_call_operand.vmem [shape: f32[1,32], index: 3, kind: input, shape index: {}]   ;;  %s453_s4 = inlined_call_operand.hbm [shape: bf16[24,32], index: 4, kind: input, shape index: {}]   ;;  %s454_s5 = inlined_call_operand.vmem [shape: f32[1,32], index: 5, kind: input, shape index: {}]   ;;  %s455_s6 = inlined_call_operand.hbm [shape: f32[2,32], index: 6, kind: output, shape index: {0}]   ;;  %s456_s7 = inlined_call_operand.hbm [shape: f32[2,32], index: 7, kind: output, shape index: {1}]  }
   0x1   :  { %14 = vsyncpa [#allocation6], 0 }
   0x2   :  { %15 = vsyncpa [#allocation4], 0 }
   0x3   :  { %16 = vsyncpa [#allocation10], 0  ;;  %s374_s24 = smov [#allocation5]  }
   0x4   :  { %s34_s25 = sshll.u32 %s374_s24, 4  ;;  %s35_s25 = int_to_ptr.vmem [resolvable:$true] %s34_s25 }
   0x5   :  { %s274_s26 = scalar_lea.vmem %s35_s25, 128  ;;  %p279_p1 = scmp.lt.s32.totalorder %s35_s25, %s35_s25 }
   0x6   :  { %p275_p0 = scmp.ne.s32.totalorder %s35_s25, %s274_s26  ;;  %p280_p2 = scmp.lt.s32.totalorder %s274_s26, %s274_s26 }
   0x8   :  { %p281_p3 = por %p280_p2, %p279_p1 }
   0xa   :  { %p282_p4 = pnand %p281_p3, %p275_p0 }
   0xc   :  { %285 = shalt.err (!%p282_p4)
}
   0xd   :  { %s375_s27 = smov 64   ;;  %s376_s28 = smov 4  }
   0xe   :  { %40 = dma.hbm_to_vmem [thread:$0]  %s451_s2, 128, %s35_s25, [#allocation6], %s375_s27, %s375_s27, %s376_s28  }
   0xf   :  { %s377_s8 = smov [#allocation2]   ;;  %s378_s10 = smov [#allocation7]  }
  0x10   :  { %s23_s9 = sshll.u32 %s377_s8, 4  ;;  %s48_s11 = sshll.u32 %s378_s10, 4  ;;  %s24_s9 = int_to_ptr.vmem [resolvable:$true] %s23_s9  ;;  %s49_s11 = int_to_ptr.vmem [resolvable:$true] %s48_s11 }
  0x11   :  { %s294_s12 = scalar_lea.vmem %s24_s9, 16  ;;  %s298_s13 = scalar_lea.vmem %s24_s9, 32 }
  0x12   :  { %p295_p5 = scmp.ne.s32.totalorder %s24_s9, %s294_s12  ;;  %p299_p6 = scmp.lt.s32.totalorder %s24_s9, %s24_s9 }
  0x13   :  { %p300_p7 = scmp.lt.s32.totalorder %s298_s13, %s294_s12 }
  0x15   :  { %p301_p8 = por %p300_p7, %p299_p6 }
  0x17   :  { %p302_p9 = pnand %p301_p8, %p295_p5 }
  0x19   :  { %305 = shalt.err (!%p302_p9)
}
  0x1a   :  { %26 = dma.hbm_to_vmem [thread:$0]  %s449_s0, 16, %s24_s9, [#allocation3]  }
  0x1b   :  { %s314_s16 = scalar_lea.vmem %s49_s11, 192  ;;  %p319_p11 = scmp.lt.s32.totalorder %s49_s11, %s49_s11 }
  0x1c   :  { %p315_p10 = scmp.ne.s32.totalorder %s49_s11, %s314_s16  ;;  %p320_p12 = scmp.lt.s32.totalorder %s314_s16, %s314_s16 }
  0x1e   :  { %p321_p13 = por %p320_p12, %p319_p11 }
  0x20   :  { %p322_p0 = pnand %p321_p13, %p315_p10 }
  0x22   :  { %325 = shalt.err (!%p322_p0)
}
  0x23   :  { %54 = dma.hbm_to_vmem [thread:$0]  %s453_s4, 192, %s49_s11, [#allocation6], %s375_s27, %s375_s27, %s376_s28  }
  0x24   :  { %366 = dma.done.wait [#allocation3], 16  }
  0x25   :  { %367 = vsyncadd [#allocation3], 4294967280 }
  0x26   :  { %368 = dma.done.wait [#allocation6], 320  }
  0x27   :  { %369 = vsyncadd [#allocation6], 4294966976  ;;  %v379_v0 = vmov 0.0   ;;  %vm380_vm0 = vmmov 0   ;;  %v263_v1 = vld [vmem:[#allocation5] sm:$0xff]   ;;  %vm151_vm1 = vcmask 1043456  }
  0x28   :  { %240 = vmatprep.subr.bf16.mxu0 %v379_v0  ;;  %246 = vmatprep.subr.bf16.mxu1 %v379_v0  ;;  %v264_v2 = vld [vmem:[#allocation7 + $0x8] ss:$0 sps:$4 sm:$0xff]   ;;  %vm83_vm2 = vcmask 130048   ;;  %v67_v3 = vld [vmem:[#allocation2] sm:$0x1]  ;;  %v265_v5 = vld [vmem:[#allocation7] sm:$0xff]  }
  0x29   :  { %242 = vmatprep.mubr.msk.bf16.mxu0 %vm380_vm0, %v379_v0  ;;  %250 = vmatprep.mubr.msk.bf16.mxu1 %vm380_vm0, %v379_v0  ;;  %v153_v4 = vsel %vm151_vm1, %v264_v2, 0  ;;  %v127_v6 = vld [vmem:[%s450_s1] sm:$0x1]  ;;  %vm147_vm3 = vcmask 195584   ;;  %s381_s20 = smov [#allocation9]   ;;  %vm195_vm4 = vcmask 254976  }
  0x2a   :  { %241 = vmatpush3.bf16.msra.mxu0 %v263_v1  ;;  %247 = vmatpush3.bf16.msra.mxu1 %v153_v4  ;;  %v228_v7 = vld [vmem:[%s452_s3] ss:$0 sm:$0xff]  ;;  %s214_s21 = sshll.u32 %s381_s20, 4  ;;  %s382_s22 = smov [#allocation8]   ;;  %s215_s21 = int_to_ptr.vmem [resolvable:$true] %s214_s21 }
  0x2b   :  { %248 = vmatprep.subr.bf16.mxu1 %v379_v0  ;;  %s204_s23 = sshll.u32 %s382_s22, 4  ;;  %v231_v12 = vld [vmem:[%s454_s5] ss:$0 sm:$0xff]  ;;  %s326_s25 = scalar_lea.vmem %s215_s21, 32  ;;  %s205_s23 = int_to_ptr.vmem [resolvable:$true] %s204_s23 }
  0x2c   :  { %p327_p1 = scmp.ne.s32.totalorder %s215_s21, %s326_s25  ;;  %p331_p2 = scmp.lt.s32.totalorder %s215_s21, %s215_s21 }
  0x2d   :  { %243 = vmatmul.mubr.msk.bf16.vlgmr.msra.gmra.mxu0 %vm83_vm2, %v67_v3  ;;  %p332_p3 = scmp.lt.s32.totalorder %s326_s25, %s326_s25 }
  0x2e   :  { %249 = vmatpush3.bf16.msra.mxu1 %v265_v5 }
  0x2f   :  { %p333_p4 = por %p332_p3, %p331_p2 }
  0x31   :  { %251 = vmatmul.mubr.msk.bf16.vlgmr.msra.gmra.mxu1 %vm147_vm3, %v127_v6  ;;  %p334_p5 = pnand %p333_p4, %p327_p1 }
  0xed   :  { %v121_v8 = vpop.f32.mrf.mxu0 }
  0xee   :  { %v122_v9 = vadd.f32 %v228_v7, %v121_v8 }
  0xef   :  { %v244_v10 = vpop.f32.mrf.mxu0 }
  0xf0   :  { %196 = vst.msk [vmem:[#allocation9] sm:$0x3] %vm195_vm4, %v122_v9 }
  0xf1   :  { %v124_v11 = vpop.f32.mrf.mxu0 }
  0xf2   :  { %337 = shalt.err (!%p334_p5)
}
  0xf3   :  { %217 = dma.vmem_to_hbm [thread:$0]  %s215_s21, 32, %s456_s7, [#allocation10]   ;;  %v189_v13 = vpop.f32.mrf.mxu1  ;;  %v245_v14 = vpop.f32.mrf.mxu0 }
  0xf4   :  { %v190_v15 = vadd.f32 %v231_v12, %v189_v13  ;;  %s346_s5 = scalar_lea.vmem %s205_s23, 32  ;;  %p351_p7 = scmp.lt.s32.totalorder %s205_s23, %s205_s23 }
  0xf5   :  { %v252_v16 = vpop.f32.mrf.mxu1  ;;  %p347_p6 = scmp.ne.s32.totalorder %s205_s23, %s346_s5  ;;  %p352_p8 = scmp.lt.s32.totalorder %s346_s5, %s346_s5 }
  0xf6   :  { %197 = vst.msk [vmem:[#allocation8] sm:$0x3] %vm195_vm4, %v190_v15 }
  0xf7   :  { %v192_v17 = vpop.f32.mrf.mxu1  ;;  %p353_p9 = por %p352_p8, %p351_p7 }
  0xf9   :  { %p354_p10 = pnand %p353_p9, %p347_p6 }
  0xfb   :  { %357 = shalt.err (!%p354_p10)
}
  0xfc   :  { %207 = dma.vmem_to_hbm [thread:$0]  %s205_s23, 32, %s455_s6, [#allocation4]   ;;  %v253_v18 = vpop.f32.mrf.mxu1 }
  0xfd   :  { %370 = dma.done.wait [#allocation4], 32  }
  0xfe   :  { %371 = vsyncadd [#allocation4], 4294967264 }
  0xff   :  { %372 = dma.done.wait [#allocation10], 32  }
 0x100   :  { %373 = vsyncadd [#allocation10], 4294967264 }
 0x101   :  { %224 = vsyncpa [#allocation3], 1 }
 0x102   :  { %225 = vsyncpa [#allocation6], 1 }
 0x103   :  { %226 = vsyncpa [#allocation4], 1 }
 0x104   :  { %227 = vsyncpa [#allocation10], 1 }

// kernel: tpu_custom_call.1
= control target key start
LH: loop header
LB: loop body
LE: loop exit
PB: predicated region body
PF: predicated region fallthrough
CT: control target
= control target key end

     0   :  { %13 = vsyncpa [#allocation3], 0  ;;  %s449_s0 = inlined_call_operand.hbm [shape: bf16[2,16], index: 0, kind: input, shape index: {}]   ;;  %s450_s1 = inlined_call_operand.vmem [shape: bf16[2,24], index: 1, kind: input, shape index: {}]   ;;  %s451_s2 = inlined_call_operand.hbm [shape: bf16[16,32], index: 2, kind: input, shape index: {}]   ;;  %s452_s3 = inlined_call_operand.vmem [shape: f32[1,32], index: 3, kind: input, shape index: {}]   ;;  %s453_s4 = inlined_call_operand.hbm [shape: bf16[24,32], index: 4, kind: input, shape index: {}]   ;;  %s454_s5 = inlined_call_operand.vmem [shape: f32[1,32], index: 5, kind: input, shape index: {}]   ;;  %s455_s6 = inlined_call_operand.hbm [shape: f32[2,32], index: 6, kind: output, shape index: {0}]   ;;  %s456_s7 = inlined_call_operand.hbm [shape: f32[2,32], index: 7, kind: output, shape index: {1}]  }
   0x1   :  { %14 = vsyncpa [#allocation6], 0 }
   0x2   :  { %15 = vsyncpa [#allocation4], 0 }
   0x3   :  { %16 = vsyncpa [#allocation10], 0  ;;  %s374_s24 = smov [#allocation5]  }
   0x4   :  { %s34_s25 = sshll.u32 %s374_s24, 4  ;;  %s35_s25 = int_to_ptr.vmem [resolvable:$true] %s34_s25 }
   0x5   :  { %s274_s26 = scalar_lea.vmem %s35_s25, 128  ;;  %p279_p1 = scmp.lt.s32.totalorder %s35_s25, %s35_s25 }
   0x6   :  { %p275_p0 = scmp.ne.s32.totalorder %s35_s25, %s274_s26  ;;  %p280_p2 = scmp.lt.s32.totalorder %s274_s26, %s274_s26 }
   0x8   :  { %p281_p3 = por %p280_p2, %p279_p1 }
   0xa   :  { %p282_p4 = pnand %p281_p3, %p275_p0 }
   0xc   :  { %285 = shalt.err (!%p282_p4)
}
   0xd   :  { %s375_s27 = smov 64   ;;  %s376_s28 = smov 4  }
   0xe   :  { %40 = dma.hbm_to_vmem [thread:$0]  %s451_s2, 128, %s35_s25, [#allocation6], %s375_s27, %s375_s27, %s376_s28  }
   0xf   :  { %s377_s8 = smov [#allocation2]   ;;  %s378_s10 = smov [#allocation7]  }
  0x10   :  { %s23_s9 = sshll.u32 %s377_s8, 4  ;;  %s48_s11 = sshll.u32 %s378_s10, 4  ;;  %s24_s9 = int_to_ptr.vmem [resolvable:$true] %s23_s9  ;;  %s49_s11 = int_to_ptr.vmem [resolvable:$true] %s48_s11 }
  0x11   :  { %s294_s12 = scalar_lea.vmem %s24_s9, 16  ;;  %s298_s13 = scalar_lea.vmem %s24_s9, 32 }
  0x12   :  { %p295_p5 = scmp.ne.s32.totalorder %s24_s9, %s294_s12  ;;  %p299_p6 = scmp.lt.s32.totalorder %s24_s9, %s24_s9 }
  0x13   :  { %p300_p7 = scmp.lt.s32.totalorder %s298_s13, %s294_s12 }
  0x15   :  { %p301_p8 = por %p300_p7, %p299_p6 }
  0x17   :  { %p302_p9 = pnand %p301_p8, %p295_p5 }
  0x19   :  { %305 = shalt.err (!%p302_p9)
}
  0x1a   :  { %26 = dma.hbm_to_vmem [thread:$0]  %s449_s0, 16, %s24_s9, [#allocation3]  }
  0x1b   :  { %s314_s16 = scalar_lea.vmem %s49_s11, 192  ;;  %p319_p11 = scmp.lt.s32.totalorder %s49_s11, %s49_s11 }
  0x1c   :  { %p315_p10 = scmp.ne.s32.totalorder %s49_s11, %s314_s16  ;;  %p320_p12 = scmp.lt.s32.totalorder %s314_s16, %s314_s16 }
  0x1e   :  { %p321_p13 = por %p320_p12, %p319_p11 }
  0x20   :  { %p322_p0 = pnand %p321_p13, %p315_p10 }
  0x22   :  { %325 = shalt.err (!%p322_p0)
}
  0x23   :  { %54 = dma.hbm_to_vmem [thread:$0]  %s453_s4, 192, %s49_s11, [#allocation6], %s375_s27, %s375_s27, %s376_s28  }
  0x24   :  { %366 = dma.done.wait [#allocation3], 16  }
  0x25   :  { %367 = vsyncadd [#allocation3], 4294967280 }
  0x26   :  { %368 = dma.done.wait [#allocation6], 320  }
  0x27   :  { %369 = vsyncadd [#allocation6], 4294966976  ;;  %v379_v0 = vmov 0.0   ;;  %vm380_vm0 = vmmov 0   ;;  %v263_v1 = vld [vmem:[#allocation5] sm:$0xff]   ;;  %vm151_vm1 = vcmask 1043456  }
  0x28   :  { %240 = vmatprep.subr.bf16.mxu0 %v379_v0  ;;  %246 = vmatprep.subr.bf16.mxu1 %v379_v0  ;;  %v264_v2 = vld [vmem:[#allocation7 + $0x8] ss:$0 sps:$4 sm:$0xff]   ;;  %vm83_vm2 = vcmask 130048   ;;  %v67_v3 = vld [vmem:[#allocation2] sm:$0x1]  ;;  %v265_v5 = vld [vmem:[#allocation7] sm:$0xff]  }
  0x29   :  { %242 = vmatprep.mubr.msk.bf16.mxu0 %vm380_vm0, %v379_v0  ;;  %250 = vmatprep.mubr.msk.bf16.mxu1 %vm380_vm0, %v379_v0  ;;  %v153_v4 = vsel %vm151_vm1, %v264_v2, 0  ;;  %v127_v6 = vld [vmem:[%s450_s1] sm:$0x1]  ;;  %vm147_vm3 = vcmask 195584   ;;  %s381_s20 = smov [#allocation9]   ;;  %vm195_vm4 = vcmask 254976  }
  0x2a   :  { %241 = vmatpush3.bf16.msra.mxu0 %v263_v1  ;;  %247 = vmatpush3.bf16.msra.mxu1 %v153_v4  ;;  %v228_v7 = vld [vmem:[%s452_s3] ss:$0 sm:$0xff]  ;;  %s214_s21 = sshll.u32 %s381_s20, 4  ;;  %s382_s22 = smov [#allocation8]   ;;  %s215_s21 = int_to_ptr.vmem [resolvable:$true] %s214_s21 }
  0x2b   :  { %248 = vmatprep.subr.bf16.mxu1 %v379_v0  ;;  %s204_s23 = sshll.u32 %s382_s22, 4  ;;  %v231_v12 = vld [vmem:[%s454_s5] ss:$0 sm:$0xff]  ;;  %s326_s25 = scalar_lea.vmem %s215_s21, 32  ;;  %s205_s23 = int_to_ptr.vmem [resolvable:$true] %s204_s23 }
  0x2c   :  { %p327_p1 = scmp.ne.s32.totalorder %s215_s21, %s326_s25  ;;  %p331_p2 = scmp.lt.s32.totalorder %s215_s21, %s215_s21 }
  0x2d   :  { %243 = vmatmul.mubr.msk.bf16.vlgmr.msra.gmra.mxu0 %vm83_vm2, %v67_v3  ;;  %p332_p3 = scmp.lt.s32.totalorder %s326_s25, %s326_s25 }
  0x2e   :  { %249 = vmatpush3.bf16.msra.mxu1 %v265_v5 }
  0x2f   :  { %p333_p4 = por %p332_p3, %p331_p2 }
  0x31   :  { %251 = vmatmul.mubr.msk.bf16.vlgmr.msra.gmra.mxu1 %vm147_vm3, %v127_v6  ;;  %p334_p5 = pnand %p333_p4, %p327_p1 }
  0xed   :  { %v121_v8 = vpop.f32.mrf.mxu0 }
  0xee   :  { %v122_v9 = vadd.f32 %v228_v7, %v121_v8 }
  0xef   :  { %v244_v10 = vpop.f32.mrf.mxu0 }
  0xf0   :  { %196 = vst.msk [vmem:[#allocation9] sm:$0x3] %vm195_vm4, %v122_v9 }
  0xf1   :  { %v124_v11 = vpop.f32.mrf.mxu0 }
  0xf2   :  { %337 = shalt.err (!%p334_p5)
}
  0xf3   :  { %217 = dma.vmem_to_hbm [thread:$0]  %s215_s21, 32, %s456_s7, [#allocation10]   ;;  %v189_v13 = vpop.f32.mrf.mxu1  ;;  %v245_v14 = vpop.f32.mrf.mxu0 }
  0xf4   :  { %v190_v15 = vadd.f32 %v231_v12, %v189_v13  ;;  %s346_s5 = scalar_lea.vmem %s205_s23, 32  ;;  %p351_p7 = scmp.lt.s32.totalorder %s205_s23, %s205_s23 }
  0xf5   :  { %v252_v16 = vpop.f32.mrf.mxu1  ;;  %p347_p6 = scmp.ne.s32.totalorder %s205_s23, %s346_s5  ;;  %p352_p8 = scmp.lt.s32.totalorder %s346_s5, %s346_s5 }
  0xf6   :  { %197 = vst.msk [vmem:[#allocation8] sm:$0x3] %vm195_vm4, %v190_v15 }
  0xf7   :  { %v192_v17 = vpop.f32.mrf.mxu1  ;;  %p353_p9 = por %p352_p8, %p351_p7 }
  0xf9   :  { %p354_p10 = pnand %p353_p9, %p347_p6 }
  0xfb   :  { %357 = shalt.err (!%p354_p10)
}
  0xfc   :  { %207 = dma.vmem_to_hbm [thread:$0]  %s205_s23, 32, %s455_s6, [#allocation4]   ;;  %v253_v18 = vpop.f32.mrf.mxu1 }
  0xfd   :  { %370 = dma.done.wait [#allocation4], 32  }
  0xfe   :  { %371 = vsyncadd [#allocation4], 4294967264 }
  0xff   :  { %372 = dma.done.wait [#allocation10], 32  }
 0x100   :  { %373 = vsyncadd [#allocation10], 4294967264 }
 0x101   :  { %224 = vsyncpa [#allocation3], 1 }
 0x102   :  { %225 = vsyncpa [#allocation6], 1 }
 0x103   :  { %226 = vsyncpa [#allocation4], 1 }
 0x104   :  { %227 = vsyncpa [#allocation10], 1 }

</bundles_post_ra>
